<compile_context>
chip_gen: v7x
topology: tpu7x:2x2x1
jax: 0.10.0
libtpu: 0.0.40
codegen_flags: <defaults>
</compile_context>

<pallas_src>
import functools

import jax
import jax.numpy as jnp
from jax.experimental import pallas as pl
from jax.experimental.pallas import tpu as pltpu


def _round_up(x, m):
    return (x + m - 1) // m * m


def _project_kernel(x_ref, w_ref, b_ref, q_ref, k_ref, v_ref, *, dp):
    """Grid = (B, tiles). One fused matmul projects an x tile into Q/K/V."""
    x = x_ref[0]                                                     # (T, C) bf16
    qkv = jnp.dot(x, w_ref[...], preferred_element_type=jnp.float32) + b_ref[...]
    q_ref[0] = qkv[:, :dp].astype(jnp.bfloat16)
    k_ref[0] = qkv[:, dp:2 * dp].astype(jnp.bfloat16)
    v_ref[0] = qkv[:, 2 * dp:].astype(jnp.bfloat16)


def _attention_kernel(q_ref, k_ref, v_ref, xres_ref, bias_ref, gamma_ref,
                      o_ref, m_scr, l_scr, acc_scr, *, masked):
    """Grid = (B, q_tiles, kv_tiles); online softmax over the kv axis."""
    ki = pl.program_id(2)
    nk = pl.num_programs(2)

    # ---- init per (batch, query tile) ----
    @pl.when(ki == 0)
    def _():
        m_scr[...] = jnp.full_like(m_scr, -jnp.inf)
        l_scr[...] = jnp.zeros_like(l_scr)
        acc_scr[...] = jnp.zeros_like(acc_scr)

    # scores (tq, tk): contract last axes of q and k directly (no k.T copy)
    s = jax.lax.dot_general(q_ref[0], k_ref[0], (((1,), (1,)), ((), ())),
                            preferred_element_type=jnp.float32)
    if masked:                       # static: only emitted when N was padded
        s = s + bias_ref[...]        # (1, tk) row: 0 for valid keys, -1e30 padded

    # ---- online softmax update (f32 state) ----
    m_prev = m_scr[...]
    m_new = jnp.maximum(m_prev, jnp.max(s, axis=-1, keepdims=True))
    alpha = jnp.exp(m_prev - m_new)
    p = jnp.exp(s - m_new)
    l_scr[...] = alpha * l_scr[...] + jnp.sum(p, axis=-1, keepdims=True)
    acc_scr[...] = alpha * acc_scr[...] + jnp.dot(
        p.astype(jnp.bfloat16), v_ref[0], preferred_element_type=jnp.float32)
    m_scr[...] = m_new

    # ---- finalize: normalize, gamma-scale, residual add ----
    @pl.when(ki == nk - 1)
    def _():
        out = acc_scr[...] * pl.reciprocal(l_scr[...], approx=True)
        o_ref[0] = (gamma_ref[0, 0] * out
                    + xres_ref[0].astype(jnp.float32)).astype(o_ref.dtype)


def attention_block(x_nchw, wq, wk, wv, bq, bk, bv, gamma, *, max_tile=256):
    """x_nchw: (B, C, H, W) float32, PyTorch layout. Returns (B, C, H, W) f32.

    max_tile=256 feeds the 2x256x256 MXUs on v6e/v7x; use 128 on v5e.
    """
    assert max_tile % 128 == 0, "max_tile must be a multiple of 128"
    B, C, H, W = x_nchw.shape
    N = H * W
    C8 = wq.shape[1]

    DP = _round_up(C8, 128)                    # q/k width padded to a lane tile
    TILE = max_tile if N >= max_tile else _round_up(N, 8)
    Npad = _round_up(N, TILE)                  # padding < TILE by construction
    nq = Npad // TILE
    masked = Npad != N

    # NCHW -> (B, N, C) channels-last; bf16 cast fuses with the transpose.
    # TODO(synk): in a channels-last end-to-end model these transposes vanish.
    x = jnp.transpose(x_nchw.reshape(B, C, N), (0, 2, 1)).astype(jnp.bfloat16)
    if masked:
        x = jnp.pad(x, ((0, 0), (0, Npad - N), (0, 0)))

    # Fused [Wq|Wk|Wv]; q/k columns zero-padded to DP (scores unchanged).
    w_qkv = jnp.concatenate(
        [jnp.pad(wq, ((0, 0), (0, DP - C8))),
         jnp.pad(wk, ((0, 0), (0, DP - C8))),
         wv], axis=1).astype(jnp.bfloat16)                      # (C, 2*DP + C)
    b_qkv = jnp.concatenate(
        [jnp.pad(bq, (0, DP - C8)),
         jnp.pad(bk, (0, DP - C8)),
         bv]).reshape(1, 2 * DP + C).astype(jnp.float32)
    g2 = jnp.asarray(gamma, jnp.float32).reshape(1, 1)

    # Additive score bias implementing the key-padding mask (cheap vadd).
    if masked:
        pos = jnp.arange(Npad)
        score_bias = jnp.where(pos < N, 0.0, -1e30).astype(jnp.float32).reshape(1, Npad)
    else:
        score_bias = jnp.zeros((1, Npad), jnp.float32)

    # ---- Stage 1: project Q / K / V once per position (bf16 -> HBM) ----
    q_p, k_p, v_p = pl.pallas_call(
        functools.partial(_project_kernel, dp=DP),
        out_shape=(jax.ShapeDtypeStruct((B, Npad, DP), jnp.bfloat16),
                   jax.ShapeDtypeStruct((B, Npad, DP), jnp.bfloat16),
                   jax.ShapeDtypeStruct((B, Npad, C), jnp.bfloat16)),
        grid_spec=pltpu.PrefetchScalarGridSpec(
            num_scalar_prefetch=0,
            grid=(B, nq),
            in_specs=[
                pl.BlockSpec((1, TILE, C), lambda b, i: (b, i, 0)),       # x tile
                pl.BlockSpec((C, 2 * DP + C), lambda b, i: (0, 0)),       # [Wq|Wk|Wv]
                pl.BlockSpec((1, 2 * DP + C), lambda b, i: (0, 0)),       # [bq|bk|bv]
            ],
            out_specs=[
                pl.BlockSpec((1, TILE, DP), lambda b, i: (b, i, 0)),
                pl.BlockSpec((1, TILE, DP), lambda b, i: (b, i, 0)),
                pl.BlockSpec((1, TILE, C), lambda b, i: (b, i, 0)),
            ],
        ),
        compiler_params=pltpu.CompilerParams(
            dimension_semantics=("parallel", "parallel"),
            vmem_limit_bytes=32 * 1024 * 1024),
    )(x, w_qkv, b_qkv)

    # ---- Stage 2: flash attention + gamma * out + x residual ----
    y = pl.pallas_call(
        functools.partial(_attention_kernel, masked=masked),
        out_shape=jax.ShapeDtypeStruct((B, Npad, C), jnp.float32),
        grid_spec=pltpu.PrefetchScalarGridSpec(
            num_scalar_prefetch=0,
            grid=(B, nq, nq),
            in_specs=[
                pl.BlockSpec((1, TILE, DP), lambda b, qi, ki: (b, qi, 0)),  # Q tile
                pl.BlockSpec((1, TILE, DP), lambda b, qi, ki: (b, ki, 0)),  # K tile
                pl.BlockSpec((1, TILE, C), lambda b, qi, ki: (b, ki, 0)),   # V tile
                pl.BlockSpec((1, TILE, C), lambda b, qi, ki: (b, qi, 0)),   # x residual
                pl.BlockSpec((1, TILE), lambda b, qi, ki: (0, ki)),         # key mask bias
                pl.BlockSpec(memory_space=pltpu.MemorySpace.SMEM),          # gamma
            ],
            out_specs=pl.BlockSpec((1, TILE, C), lambda b, qi, ki: (b, qi, 0)),
            scratch_shapes=[
                pltpu.VMEM((TILE, 1), jnp.float32),   # running max
                pltpu.VMEM((TILE, 1), jnp.float32),   # running sum
                pltpu.VMEM((TILE, C), jnp.float32),   # output accumulator
            ],
        ),
        compiler_params=pltpu.CompilerParams(
            dimension_semantics=("parallel", "parallel", "arbitrary"),
            # Footprint is a few MB at TILE=256 -- well under the scoped
            # default on v5e/v6e/v7x; re-derive if a resident KV cache or
            # bigger tiles are adopted (v7x has 64 MiB per TensorCore).
            vmem_limit_bytes=32 * 1024 * 1024),
    )(q_p, k_p, v_p, x, score_bias, g2)

    if masked:
        y = y[:, :N, :]
    return jnp.transpose(y, (0, 2, 1)).reshape(B, C, H, W)


def attention_block_ref(x_nchw, wq, wk, wv, bq, bk, bv, gamma):
    """Pure-JAX (f32) reference mirroring the PyTorch forward."""
    B, C, H, W = x_nchw.shape
    N = H * W
    x = jnp.transpose(x_nchw.reshape(B, C, N), (0, 2, 1))          # (B, N, C)
    q = x @ wq + bq
    k = x @ wk + bk
    v = x @ wv + bv
    a = jax.nn.softmax(jnp.einsum("bic,bjc->bij", q, k), axis=-1)
    out = jnp.einsum("bij,bjc->bic", a, v)
    y = gamma.reshape(()) * out + x
    return jnp.transpose(y, (0, 2, 1)).reshape(B, C, H, W)


if __name__ == "__main__":
    B, C, H, W = 2, 32, 8, 8     # C divisible by 8 (channels // 8 projection)
    C8 = C // 8

    key = jax.random.PRNGKey(0)
    kx, kq, kk, kvw, kbq, kbk, kbv = jax.random.split(key, 7)

    x = jax.random.normal(kx, (B, C, H, W), jnp.float32)

    # Conv2d(channels, out, 1) weights stored as (in, out) for channels-last matmul.
    wq = jax.random.normal(kq, (C, C8), jnp.float32) * 0.1
    wk = jax.random.normal(kk, (C, C8), jnp.float32) * 0.1
    wv = jax.random.normal(kvw, (C, C), jnp.float32) * 0.1
    bq = jax.random.normal(kbq, (C8,), jnp.float32) * 0.1
    bk = jax.random.normal(kbk, (C8,), jnp.float32) * 0.1
    bv = jax.random.normal(kbv, (C,), jnp.float32) * 0.1

    # PyTorch __init__ sets gamma = 0 (output == x); nonzero here so the
    # attention path is actually exercised/verified.
    gamma = jnp.array([0.5], jnp.float32)

    # Case 1: N multiple of 8, single tile, no padding path.
    y = jax.block_until_ready(attention_block(x, wq, wk, wv, bq, bk, bv, gamma))
    y_ref = attention_block_ref(x, wq, wk, wv, bq, bk, bv, gamma)
    assert y.shape == (B, C, H, W)
    # bf16 MXU operands / bf16 x with f32 accumulation -> relaxed tolerance.
    assert jnp.allclose(y, y_ref, atol=2e-2, rtol=2e-2), "mismatch vs reference"

    # Case 2: non-aligned N exercises the pad + key-mask (score-bias) path.
    x2 = jax.random.normal(jax.random.PRNGKey(1), (B, C, 5, 5), jnp.float32)
    y2 = jax.block_until_ready(attention_block(x2, wq, wk, wv, bq, bk, bv, gamma))
    y2_ref = attention_block_ref(x2, wq, wk, wv, bq, bk, bv, gamma)
    assert y2.shape == (B, C, 5, 5)
    assert jnp.allclose(y2, y2_ref, atol=2e-2, rtol=2e-2), "mismatch (padded N)"

    # Case 3: N > TILE exercises the multi-kv-tile online-softmax path.
    x3 = jax.random.normal(jax.random.PRNGKey(2), (1, C, 17, 17), jnp.float32)
    y3 = jax.block_until_ready(attention_block(x3, wq, wk, wv, bq, bk, bv, gamma))
    y3_ref = attention_block_ref(x3, wq, wk, wv, bq, bk, bv, gamma)
    assert y3.shape == (1, C, 17, 17)
    assert jnp.allclose(y3, y3_ref, atol=2e-2, rtol=2e-2), "mismatch (multi-tile)"

    print("KERNEL_OK")
</pallas_src>

<mosaic_0001>
module attributes {stable_mosaic.version = 11 : i64} {
  func.func @_project_kernel(%arg0: i32, %arg1: i32, %arg2: memref<1x64x32xbf16, #tpu.memory_space<vmem>>, %arg3: memref<32x288xbf16, #tpu.memory_space<vmem>>, %arg4: memref<1x288xf32, #tpu.memory_space<vmem>>, %arg5: memref<1x64x128xbf16, #tpu.memory_space<vmem>>, %arg6: memref<1x64x128xbf16, #tpu.memory_space<vmem>>, %arg7: memref<1x64x32xbf16, #tpu.memory_space<vmem>>) attributes {dimension_semantics = [#tpu.dimension_semantics<parallel>, #tpu.dimension_semantics<parallel>], iteration_bounds = array<i64: 2, 1>, scalar_prefetch = 0 : i64, scratch_operands = 0 : i64, tpu.core_type = #tpu.core_type<tc>, window_params = [{transform_indices = @transform_0, window_bounds = array<i64: 1, 64, 32>}, {pipeline_mode = #tpu.pipeline_mode<synchronous>, transform_indices = @transform_1, window_bounds = array<i64: 32, 288>}, {pipeline_mode = #tpu.pipeline_mode<synchronous>, transform_indices = @transform_2, window_bounds = array<i64: 1, 288>}, {transform_indices = @transform_3, window_bounds = array<i64: 1, 64, 128>}, {transform_indices = @transform_4, window_bounds = array<i64: 1, 64, 128>}, {transform_indices = @transform_5, window_bounds = array<i64: 1, 64, 32>}]} {
    %c0 = arith.constant 0 : index
    %c0_0 = arith.constant 0 : index
    %c0_1 = arith.constant 0 : index
    %0 = vector.load %arg2[%c0, %c0_0, %c0_1] : memref<1x64x32xbf16, #tpu.memory_space<vmem>>, vector<1x64x32xbf16>
    %1 = vector.shape_cast %0 : vector<1x64x32xbf16> to vector<64x32xbf16>
    %c0_2 = arith.constant 0 : index
    %c0_3 = arith.constant 0 : index
    %2 = vector.load %arg3[%c0_2, %c0_3] : memref<32x288xbf16, #tpu.memory_space<vmem>>, vector<32x288xbf16>
    %cst = arith.constant dense<0.000000e+00> : vector<64x288xf32>
    %3 = tpu.matmul %1, %2, %cst {dimension_numbers = #tpu.dot_dimension_numbers<[1], [0], [0], [1], [0, 0, 1, 1], [], []>} : vector<64x32xbf16>, vector<32x288xbf16>, vector<64x288xf32> -> vector<64x288xf32>
    %c0_4 = arith.constant 0 : index
    %c0_5 = arith.constant 0 : index
    %4 = vector.load %arg4[%c0_4, %c0_5] : memref<1x288xf32, #tpu.memory_space<vmem>>, vector<1x288xf32>
    %5 = vector.broadcast %4 : vector<1x288xf32> to vector<64x288xf32>
    %6 = arith.addf %3, %5 : vector<64x288xf32>
    %7 = vector.extract_strided_slice %6 {offsets = [0, 0], sizes = [64, 128], strides = [1, 1]} : vector<64x288xf32> to vector<64x128xf32>
    %8 = arith.truncf %7 : vector<64x128xf32> to vector<64x128xbf16>
    %c0_6 = arith.constant 0 : index
    %c0_7 = arith.constant 0 : index
    %c0_8 = arith.constant 0 : index
    %9 = vector.load %arg5[%c0_6, %c0_7, %c0_8] : memref<1x64x128xbf16, #tpu.memory_space<vmem>>, vector<1x64x128xbf16>
    %10 = vector.shape_cast %9 : vector<1x64x128xbf16> to vector<64x128xbf16>
    %11 = vector.shape_cast %8 : vector<64x128xbf16> to vector<1x64x128xbf16>
    tpu.vector_store %arg5[%c0_6, %c0_7, %c0_8], %11 {strides = array<i32>} : memref<1x64x128xbf16, #tpu.memory_space<vmem>>, vector<1x64x128xbf16>,
    %12 = vector.extract_strided_slice %6 {offsets = [0, 128], sizes = [64, 128], strides = [1, 1]} : vector<64x288xf32> to vector<64x128xf32>
    %13 = arith.truncf %12 : vector<64x128xf32> to vector<64x128xbf16>
    %c0_9 = arith.constant 0 : index
    %c0_10 = arith.constant 0 : index
    %c0_11 = arith.constant 0 : index
    %14 = vector.load %arg6[%c0_9, %c0_10, %c0_11] : memref<1x64x128xbf16, #tpu.memory_space<vmem>>, vector<1x64x128xbf16>
    %15 = vector.shape_cast %14 : vector<1x64x128xbf16> to vector<64x128xbf16>
    %16 = vector.shape_cast %13 : vector<64x128xbf16> to vector<1x64x128xbf16>
    tpu.vector_store %arg6[%c0_9, %c0_10, %c0_11], %16 {strides = array<i32>} : memref<1x64x128xbf16, #tpu.memory_space<vmem>>, vector<1x64x128xbf16>,
    %17 = vector.extract_strided_slice %6 {offsets = [0, 256], sizes = [64, 32], strides = [1, 1]} : vector<64x288xf32> to vector<64x32xf32>
    %18 = arith.truncf %17 : vector<64x32xf32> to vector<64x32xbf16>
    %c0_12 = arith.constant 0 : index
    %c0_13 = arith.constant 0 : index
    %c0_14 = arith.constant 0 : index
    %19 = vector.load %arg7[%c0_12, %c0_13, %c0_14] : memref<1x64x32xbf16, #tpu.memory_space<vmem>>, vector<1x64x32xbf16>
    %20 = vector.shape_cast %19 : vector<1x64x32xbf16> to vector<64x32xbf16>
    %21 = vector.shape_cast %18 : vector<64x32xbf16> to vector<1x64x32xbf16>
    tpu.vector_store %arg7[%c0_12, %c0_13, %c0_14], %21 {strides = array<i32>} : memref<1x64x32xbf16, #tpu.memory_space<vmem>>, vector<1x64x32xbf16>,
    return
  }
  func.func @transform_0(%arg0: i32, %arg1: i32) -> (i32, i32, i32) {
    %c0_i32 = arith.constant 0 : i32
    %c0_i32_0 = arith.constant 0 : i32
    return %arg0, %arg1, %c0_i32 : i32, i32, i32
  }
  func.func @transform_1(%arg0: i32, %arg1: i32) -> (i32, i32) {
    %c0_i32 = arith.constant 0 : i32
    %c0_i32_0 = arith.constant 0 : i32
    %c0_i32_1 = arith.constant 0 : i32
    return %c0_i32, %c0_i32_0 : i32, i32
  }
  func.func @transform_2(%arg0: i32, %arg1: i32) -> (i32, i32) {
    %c0_i32 = arith.constant 0 : i32
    %c0_i32_0 = arith.constant 0 : i32
    %c0_i32_1 = arith.constant 0 : i32
    return %c0_i32, %c0_i32_0 : i32, i32
  }
  func.func @transform_3(%arg0: i32, %arg1: i32) -> (i32, i32, i32) {
    %c0_i32 = arith.constant 0 : i32
    %c0_i32_0 = arith.constant 0 : i32
    return %arg0, %arg1, %c0_i32 : i32, i32, i32
  }
  func.func @transform_4(%arg0: i32, %arg1: i32) -> (i32, i32, i32) {
    %c0_i32 = arith.constant 0 : i32
    %c0_i32_0 = arith.constant 0 : i32
    return %arg0, %arg1, %c0_i32 : i32, i32, i32
  }
  func.func @transform_5(%arg0: i32, %arg1: i32) -> (i32, i32, i32) {
    %c0_i32 = arith.constant 0 : i32
    %c0_i32_0 = arith.constant 0 : i32
    return %arg0, %arg1, %c0_i32 : i32, i32, i32
  }
}

</mosaic_0001>

<bundles_post_ra>
// kernel: tpu_custom_call.1
= control target key start
LH: loop header
LB: loop body
LE: loop exit
PB: predicated region body
PF: predicated region fallthrough
CT: control target
= control target key end

     0   :  { %11 = vsyncpa [#allocation3], 0  ;;  %s1477_s0 = inlined_call_operand.vmem [shape: bf16[2,64,32], index: 0, kind: input, shape index: {}]   ;;  %s1478_s1 = inlined_call_operand.vmem [shape: bf16[32,288], index: 1, kind: input, shape index: {}]   ;;  %s1479_s2 = inlined_call_operand.vmem [shape: f32[1,288], index: 2, kind: input, shape index: {}]   ;;  %s1480_s3 = inlined_call_operand.hbm [shape: bf16[2,64,128], index: 3, kind: output, shape index: {0}]   ;;  %s1481_s4 = inlined_call_operand.hbm [shape: bf16[2,64,128], index: 4, kind: output, shape index: {1}]   ;;  %s1482_s5 = inlined_call_operand.vmem [shape: bf16[2,64,32], index: 5, kind: output, shape index: {2}]  }
   0x1   :  { %13 = vsyncpa [#allocation3 + $0x1], 0 }
   0x2   :  { %14 = vsyncpa [#allocation5], 0 }
   0x3   :  { %16 = vsyncpa [#allocation5 + $0x1], 0  ;;  %s1231_s18 = smov 0   ;;  %s1233_s19 = smov 0  }
   0x4   :  { %s1235_s20 = smov 0   ;;  %s1237_s21 = smov 0  }
   0x5   :  { %s1239_s22 = smov 0   ;;  %s1241_s23 = smov 0  }
   0x6 LB: > { %s852_s24 = sadd.s32 4294967295, %s1194_s23   ;;  %s853_s25 = sadd.s32 4294967294, %s1194_s23   ;;  %s1194_s23 = sphi %s1241_s23, %s22_s23   ;;  %s1190_s22 = sphi %s1239_s22, %s1489_s22   ;;  %s1186_s21 = sphi %s1237_s21, %s1488_s21   ;;  %s1182_s20 = sphi %s1235_s20, %s1487_s20   ;;  %s1178_s19 = sphi %s1233_s19, %s1486_s19   ;;  %s1174_s18 = sphi %s1231_s18, %s1485_s18  }
   0x7   : > { %s34_s26 = sadd.s32 1, %s1190_s22  ;;  %s113_s27 = sadd.s32 1, %s1182_s20 }
   0x8   : > { %p36_p0 = scmp.ge.s32.totalorder %s34_s26, 2  ;;  %p123_p1 = scmp.ne.s32.totalorder %s1182_s20, %s1178_s19 }
   0x9   : > { %p124_p2 = scmp.eq.s32.totalorder %s852_s24, 1  ;;  %p129_p3 = scmp.ne.s32.totalorder %s1178_s19, %s1174_s18 }
   0xa   : > { %s1491_s26 = smov (%p36_p0, %s34_s26), 0  ;;  %p130_p5 = scmp.eq.s32.totalorder %s853_s25, 1 }
   0xb   : > { %p1271_p4 = por %p124_p2, %p123_p1  ;;  %s108_s29 = ssub.s32 %s1190_s22, %s1491_s26 }
   0xc   : > { %p856_p6 = scmp.ge.s32.totalorder %s1194_s23, 1  ;;  %p111_p7 = scmp.eq.s32.totalorder %s108_s29, 0 }
   0xd   : > { %p1278_p8 = por %p130_p5, %p129_p3  ;;  %p223_p9 = scmp.lt.s32.totalorder %s1194_s23, 3 }
   0xe   : > { %s1284_s6 = scalar_select %p111_p7, %s1182_s20, %s113_s27  }
   0xf   : > { %p224_p10 = pnand %p856_p6, %p223_p9 }
  0x10   : > { %v1072_v0 = vld [vmem:[%s1478_s1 + $0x4] ss:$12 sps:$4 sm:$0xff] (!%p224_p10)   ;;  %p270_p11 = scmp.lt.s32.totalorder (!%p224_p10), %s1186_s21, 1  ;;  %v1074_v1 = vld [vmem:[%s1478_s1] ss:$12 sps:$4 sm:$0xff] (!%p224_p10)   ;;  %v1196_v2 = vmov (!%p224_p10), 0   ;;  %v310_v11 = vlaneseq (!%p224_p10) }
  0x11   : > { %227 = sbr.rel (%p224_p10) target bundleno = 302 (0x12e), region = 32  ;;  %422 = vmatprep.mubr.bf16.mxu0 (!%p224_p10), %v1196_v2  ;;  %452 = vmatprep.mubr.bf16.mxu1 (!%p224_p10), %v1196_v2  ;;  %v1075_v3 = vld [vmem:[%s1478_s1 + $0x1c] ss:$12 sps:$4 sm:$0xff] (!%p224_p10)   ;;  %v1077_v4 = vld [vmem:[%s1478_s1 + $0x18] ss:$12 sps:$4 sm:$0xff] (!%p224_p10)   ;;  %vm377_vm0 = vcmask (!%p224_p10), 261120  }
  0x12   : > { %390 = vmatprep.subr.bf16.mxu0 (!%p224_p10), %v1072_v0  ;;  %1005 = vmatprep.subr.bf16.mxu1 (!%p224_p10), %v1072_v0  ;;  %v1080_v5 = vld [vmem:[%s1478_s1 + $0x8] ss:$12 sps:$4 sm:$0xff] (!%p224_p10)   ;;  %v1081_v8 = vld [vmem:[%s1478_s1 + $0x20] ss:$12 sps:$4 sm:$0xff] (!%p224_p10)   ;;  %v311_v12 = vshrl.u32 (!%p224_p10), %v310_v11, 7  ;;  %s1328_s11 = sand.u32 (!%p224_p10), 1, %s1178_s19  }
  0x13   : > { %391 = vmatpush1.bf16.msra.mxu0 (!%p224_p10), %v1074_v1  ;;  %1007 = vmatpush1.bf16.msra.mxu1 (!%p224_p10), %v1074_v1  ;;  %v308_v14 = vld [vmem:[%s1479_s2] sm:$0x7] (!%p224_p10)  ;;  %s857_s12 = sshll.u32 (!%p224_p10), %s1328_s11, 5  ;;  %vm640_vm1 = vcmask (!%p224_p10), 257024   ;;  %s1197_s17 = smov (!%p224_p10), [#allocation2]  }
  0x14   : > { %392 = vmatprep.subr.bf16.mxu0 (!%p224_p10), %v1075_v3  ;;  %1006 = vmatprep.subr.bf16.mxu1 (!%p224_p10), %v1075_v3  ;;  %v312_v13 = vsub.s32 (!%p224_p10), 0, %v311_v12  ;;  %v316_v15 = vsub.s32 (!%p224_p10), 1, %v311_v12  ;;  %v320_v23 = vsub.s32 (!%p224_p10), 2, %v311_v12  ;;  %s1341_s13 = scalar_lea.vmem (!%p224_p10), [#allocation2], %s857_s12  ;;  %s1345_s14 = scalar_lea.vmem (!%p224_p10), [#allocation4], %s857_s12 }
  0x15   : > { %s697_s27 = sshll.u32 (!%p224_p10), %s1345_s14, 4  ;;  %s650_s12 = scalar_lea.sflag (!%p224_p10), [#allocation3], %s1328_s11  ;;  %s1386_s27 = int_to_ptr.vmem [resolvable:$true] %s697_s27 }
  0x16   : > { %v1325_v16 = vrot.slane (!%p224_p10), %v308_v14, %v312_v13  ;;  %v1330_v19 = vrot.slane (!%p224_p10), %v308_v14, %v316_v15  ;;  %v321_v37 = vrot.slane (!%p224_p10), %v308_v14, %v320_v23 }
  0x17   : > { %393 = vmatpush1.bf16.msra.mxu0 (!%p224_p10), %v1077_v4  ;;  %1008 = vmatpush1.bf16.msra.mxu1 (!%p224_p10), %v1077_v4 }
  0x18   : > { %s1300_s15 = scalar_select %p270_p11, %s1186_s21, 1  ;;  %993 = vmatprep.subr.bf16.mxu1 %v1080_v5 }
  0x1a   : > { %s913_s24 = sshll.u32 %s1300_s15, 5  ;;  %s679_s15 = sshll.u32 %s1341_s13, 4  ;;  %s1375_s15 = int_to_ptr.vmem [resolvable:$true] %s679_s15 }
  0x1b   : > { %s277_s29 = scalar_lea.vmem %s1477_s0, %s913_s24  ;;  %s1354_s25 = scalar_lea.vmem %s1482_s5, %s913_s24 }
  0x1c   : > { %v1078_v6 = vld [vmem:[%s277_s29] sm:$0xff]   ;;  %v1079_v7 = vld [vmem:[%s277_s29 + $0x18] sm:$0xff]   ;;  %v1082_v9 = vld [vmem:[%s277_s29 + $0x8] sm:$0xff]   ;;  %s939_s24 = sshll.u32 %s1186_s21, 9  ;;  %s1084_s16 = scalar_lea.vmem %s1375_s15, 512 }
  0x1d   : > { %873 = vmatmul.mubr.msk.bf16.vlgmr.msra.gmra.mrb[0].mxu0 %vm377_vm0, %v1078_v6  ;;  %876 = vmatmul.mubr.msk.bf16.vlgmr.msra.gmra.mrb[0].mxu1 %vm377_vm0, %v1079_v7  ;;  %v1083_v10 = vld [vmem:[%s277_s29 + $0x10] sm:$0xff]   ;;  %s1382_s7 = scalar_lea.hbm %s1480_s3, %s939_s24  ;;  %s1393_s10 = scalar_lea.hbm %s1481_s4, %s939_s24 }
  0x1e   : > { %994 = vmatpush3.bf16.msra.mxu1 %v1080_v5  ;;  %432 = vmatprep.mubr.bf16.mxu0 %v1196_v2  ;;  %p1085_p12 = scmp.ne.s32.totalorder %s1375_s15, %s1084_s16  ;;  %s1088_s21 = sshll.u32 %s1197_s17, 4  ;;  %s1089_s21 = int_to_ptr.vmem [resolvable:$false] %s1088_s21 }
  0x1f   : > { %995 = vmatprep.subr.bf16.mxu1 %v1081_v8  ;;  %997 = vmatprep.mubr.msk.bf16.mxu1 %vm377_vm0, %v1078_v6  ;;  %s1090_s29 = scalar_lea.vmem %s1089_s21, 1024  ;;  %p1091_p1 = scmp.lt.s32.totalorder %s1375_s15, %s1089_s21 }
  0x20   : > { %p1086_p13 = pnand %p1085_p12, %p1271_p4  ;;  %p1092_p2 = scmp.lt.s32.totalorder %s1090_s29, %s1084_s16 }
  0x22   : > { %996 = vmatpush3.bf16.msra.mxu1 %v1081_v8  ;;  %p1087_p0 = pneg %p1086_p13  ;;  %p1093_p3 = por %p1092_p2, %p1091_p1 }
  0x24   : > { %p1094_p5 = pnand %p1093_p3, %p1087_p0 }
  0x25   : > { %874 = vmatmul.mubr.msk.bf16.gmra.mrb[4].mxu0 %vm377_vm0, %v1082_v9  ;;  %998 = vmatmul.mubr.msk.bf16.vlgmr.msra.gmra.mrb[4].mxu1 %vm377_vm0, %v1082_v9 }
  0x26   : > { %442 = vmatprep.mubr.bf16.mxu0 %v1196_v2  ;;  %1001 = vmatprep.mubr.msk.bf16.mxu1 %vm377_vm0, %v1083_v10 }
  0x2d   : > { %875 = vmatmul.mubr.msk.bf16.gmra.mrb[8].mxu0 %vm377_vm0, %v1083_v10  ;;  %1002 = vmatmul.mubr.msk.bf16.gmra.mrb[8].mxu1 %vm377_vm0, %v1079_v7 }
  0xf0   : > { %v424_v17 = vpop.f32.mrb[0].mxu0  ;;  %v454_v18 = vpop.f32.mrb[0].mxu1 }
  0xf1   : > { %v455_v20 = vadd.f32 %v454_v18, %v1325_v16  ;;  %v426_v21 = vpop.f32.mrb[1].mxu0  ;;  %v456_v22 = vpop.f32.mrb[1].mxu1  ;;  %v425_v26 = vadd.f32 %v424_v17, %v1325_v16 }
  0xf2   : > { %v428_v24 = vpop.f32.mrb[2].mxu0  ;;  %v458_v25 = vpop.f32.mrb[2].mxu1  ;;  %v427_v31 = vadd.f32 %v426_v21, %v1330_v19  ;;  %v457_v32 = vadd.f32 %v456_v22, %v1330_v19 }
  0xf3   : > { %v429_v27 = vadd.f32 %v428_v24, %v1325_v16  ;;  %v459_v28 = vadd.f32 %v458_v25, %v1325_v16  ;;  %v430_v29 = vpop.f32.mrb[3].mxu0  ;;  %v460_v30 = vpop.f32.mrb[3].mxu1 }
  0xf4   : > { %v431_v33 = vadd.f32 %v430_v29, %v1330_v19  ;;  %v461_v34 = vadd.f32 %v460_v30, %v1330_v19 }
  0xf5   : > { %v944_v35 = vpack.c.bf16 %v429_v27, %v425_v26  ;;  %v959_v36 = vpack.c.bf16 %v459_v28, %v455_v20 }
  0xf6   : > { %v964_v38 = vpack.c.bf16 %v431_v33, %v427_v31  ;;  %v979_v39 = vpack.c.bf16 %v461_v34, %v457_v32 }
  0xf7   : > { %945 = vst [vmem:[%s1341_s13] sm:$0xff] %v944_v35   ;;  %983 = vst [vmem:[%s1341_s13 + $0x18] sm:$0xff] %v959_v36  }
  0xf8   : > { %965 = vst [vmem:[%s1345_s14] sm:$0xff] %v964_v38   ;;  %986 = vst [vmem:[%s1345_s14 + $0x18] sm:$0xff] %v979_v39   ;;  %v434_v40 = vpop.f32.mrb[4].mxu0  ;;  %v999_v41 = vpop.f32.mrb[4].mxu1 }
  0xf9   : > { %v506_v42 = vadd.f32 %v999_v41, %v321_v37  ;;  %v436_v43 = vpop.f32.mrb[5].mxu0  ;;  %v497_v44 = vpop.f32.mrb[5].mxu1  ;;  %v435_v48 = vadd.f32 %v434_v40, %v1325_v16 }
  0xfa   : > { %v498_v45 = vadd.f32 %v497_v44, %v321_v37  ;;  %v438_v46 = vpop.f32.mrb[6].mxu0  ;;  %v1000_v47 = vpop.f32.mrb[6].mxu1  ;;  %v437_v54 = vadd.f32 %v436_v43, %v1330_v19 }
  0xfb   : > { %v933_v49 = vpack.c.bf16 %v506_v42, %v506_v42  ;;  %v439_v50 = vadd.f32 %v438_v46, %v1325_v16  ;;  %v509_v51 = vadd.f32 %v1000_v47, %v321_v37  ;;  %v440_v52 = vpop.f32.mrb[7].mxu0  ;;  %v500_v53 = vpop.f32.mrb[7].mxu1 }
  0xfc   : > { %v931_v55 = vpack.c.bf16 %v498_v45, %v498_v45  ;;  %v441_v56 = vadd.f32 %v440_v52, %v1330_v19  ;;  %v501_v57 = vadd.f32 %v500_v53, %v321_v37 }
  0xfd   : > { %643 = vst.msk [vmem:[%s1354_s25 + $0x8] sm:$0xf] %vm640_vm1, %v933_v49  ;;  %v949_v58 = vpack.c.bf16 %v439_v50, %v435_v48  ;;  %v934_v59 = vpack.c.bf16 %v509_v51, %v509_v51 }
  0xfe   : > { %641 = vst.msk [vmem:[%s1354_s25] sm:$0xf] %vm640_vm1, %v931_v55  ;;  %v969_v60 = vpack.c.bf16 %v441_v56, %v437_v54  ;;  %v932_v61 = vpack.c.bf16 %v501_v57, %v501_v57 }
  0xff   : > { %981 = vst [vmem:[%s1341_s13 + $0x8] sm:$0xff] %v949_v58   ;;  %644 = vst.msk [vmem:[%s1354_s25 + $0xc] sm:$0xf] %vm640_vm1, %v934_v59 }
 0x100   : > { %984 = vst [vmem:[%s1345_s14 + $0x8] sm:$0xff] %v969_v60   ;;  %642 = vst.msk [vmem:[%s1354_s25 + $0x4] sm:$0xf] %vm640_vm1, %v932_v61  ;;  %v444_v62 = vpop.f32.mrb[8].mxu0  ;;  %v1003_v63 = vpop.f32.mrb[8].mxu1 }
 0x101   : > { %v522_v0 = vadd.f32 %v1003_v63, %v321_v37  ;;  %v446_v1 = vpop.f32.mrb[9].mxu0  ;;  %v513_v2 = vpop.f32.mrb[9].mxu1  ;;  %v445_v6 = vadd.f32 %v444_v62, %v1325_v16 }
 0x102   : > { %v514_v3 = vadd.f32 %v513_v2, %v321_v37  ;;  %v448_v4 = vpop.f32.mrb[10].mxu0  ;;  %v1004_v5 = vpop.f32.mrb[10].mxu1  ;;  %v447_v12 = vadd.f32 %v446_v1, %v1330_v19 }
 0x103   : > { %v937_v7 = vpack.c.bf16 %v522_v0, %v522_v0  ;;  %v449_v8 = vadd.f32 %v448_v4, %v1325_v16  ;;  %v525_v9 = vadd.f32 %v1004_v5, %v321_v37  ;;  %v450_v10 = vpop.f32.mrb[11].mxu0  ;;  %v516_v11 = vpop.f32.mrb[11].mxu1 }
 0x104   : > { %v935_v13 = vpack.c.bf16 %v514_v3, %v514_v3  ;;  %v451_v14 = vadd.f32 %v450_v10, %v1330_v19  ;;  %v517_v15 = vadd.f32 %v516_v11, %v321_v37 }
 0x105   : > { %647 = vst.msk [vmem:[%s1354_s25 + $0x18] sm:$0xf] %vm640_vm1, %v937_v7  ;;  %v954_v16 = vpack.c.bf16 %v449_v8, %v445_v6  ;;  %v938_v17 = vpack.c.bf16 %v525_v9, %v525_v9 }
 0x106   : > { %645 = vst.msk [vmem:[%s1354_s25 + $0x10] sm:$0xf] %vm640_vm1, %v935_v13  ;;  %v974_v18 = vpack.c.bf16 %v451_v14, %v447_v12  ;;  %v936_v19 = vpack.c.bf16 %v517_v15, %v517_v15 }
 0x107   : > { %982 = vst [vmem:[%s1341_s13 + $0x10] sm:$0xff] %v954_v16   ;;  %648 = vst.msk [vmem:[%s1354_s25 + $0x1c] sm:$0xf] %vm640_vm1, %v938_v17 }
 0x108   : > { %985 = vst [vmem:[%s1345_s14 + $0x10] sm:$0xff] %v974_v18   ;;  %646 = vst.msk [vmem:[%s1354_s25 + $0x14] sm:$0xf] %vm640_vm1, %v936_v19 }
 0x109   : > { %1097 = shalt.err (!%p1094_p5)
}
 0x10a   : > { %s1098_s13 = scalar_lea.hbm %s1382_s7, 512  ;;  %s1102_s24 = scalar_lea.hbm %s1480_s3, 1024 }
 0x10b   : > { %p1099_p6 = scmp.ne.s32.totalorder %s1382_s7, %s1098_s13  ;;  %p1103_p10 = scmp.lt.u32.totalorder %s1382_s7, %s1480_s3 }
 0x10c   : > { %p1104_p11 = scmp.lt.u32.totalorder %s1102_s24, %s1098_s13  ;;  %p1106_p13 = scmp.lt.u32.totalorder %s1098_s13, %s1382_s7 }
 0x10d   : > { %p1100_p7 = pnand %p1099_p6, %p1271_p4 }
 0x10e   : > { %p1105_p12 = por %p1104_p11, %p1103_p10 }
 0x10f   : > { %p1101_p9 = pneg %p1100_p7 }
 0x110   : > { %p1107_p0 = por %p1106_p13, %p1105_p12 }
 0x112   : > { %p1108_p1 = pnand %p1107_p0, %p1101_p9 }
 0x114   : > { %1111 = shalt.err (!%p1108_p1)
}
 0x115   : > { %s1198_s16 = smov 64   ;;  %s1199_s17 = smov 4  }
 0x116   : > { %1009 = dma.vmem_to_hbm [thread:$0]  (%p1271_p4), %s1375_s15, 512, %s1382_s7, %s650_s12, %s1198_s16, %s1198_s16, %s1199_s17  }
 0x117   : > { %s655_s21 = scalar_lea.sflag [#allocation5], %s1328_s11  ;;  %s1112_s29 = scalar_lea.vmem %s1386_s27, 512 }
 0x118   : > { %p1113_p2 = scmp.ne.s32.totalorder %s1386_s27, %s1112_s29  ;;  %s1200_s13 = smov [#allocation4]  }
 0x119   : > { %s1116_s14 = sshll.u32 %s1200_s13, 4  ;;  %s1117_s14 = int_to_ptr.vmem [resolvable:$false] %s1116_s14 }
 0x11a   : > { %p1114_p3 = pnand %p1113_p2, %p1271_p4  ;;  %s1118_s25 = scalar_lea.vmem %s1117_s14, 1024 }
 0x11b   : > { %p1119_p6 = scmp.lt.s32.totalorder %s1386_s27, %s1117_s14  ;;  %p1120_p7 = scmp.lt.s32.totalorder %s1118_s25, %s1112_s29 }
 0x11c   : > { %p1115_p5 = pneg %p1114_p3 }
 0x11d   : > { %p1121_p9 = por %p1120_p7, %p1119_p6 }
 0x11f   : > { %p1122_p10 = pnand %p1121_p9, %p1115_p5 }
 0x121   : > { %1125 = shalt.err (!%p1122_p10)
}
 0x122   : > { %s1126_s15 = scalar_lea.hbm %s1393_s10, 512  ;;  %s1130_s24 = scalar_lea.hbm %s1481_s4, 1024 }
 0x123   : > { %p1127_p11 = scmp.ne.s32.totalorder %s1393_s10, %s1126_s15  ;;  %p1131_p0 = scmp.lt.u32.totalorder %s1393_s10, %s1481_s4 }
 0x124   : > { %p1132_p1 = scmp.lt.u32.totalorder %s1130_s24, %s1126_s15  ;;  %p1134_p3 = scmp.lt.u32.totalorder %s1126_s15, %s1393_s10 }
 0x125   : > { %p1128_p12 = pnand %p1127_p11, %p1271_p4 }
 0x126   : > { %p1133_p2 = por %p1132_p1, %p1131_p0 }
 0x127   : > { %p1129_p13 = pneg %p1128_p12 }
 0x128   : > { %p1135_p5 = por %p1134_p3, %p1133_p2 }
 0x12a   : > { %p1136_p6 = pnand %p1135_p5, %p1129_p13 }
 0x12c   : > { %1139 = shalt.err (!%p1136_p6)
}
 0x12d   : > { %1010 = dma.vmem_to_hbm [thread:$0]  (%p1271_p4), %s1386_s27, 512, %s1393_s10, %s655_s21, %s1198_s16, %s1198_s16, %s1199_s17  }
 0x12e PF: > { %p1020_p7 = scmp.ge.s32.totalorder %s1194_s23, 2  ;;  %s716_s29 = sand.u32 1, %s1174_s18  }
 0x12f   : > { %s717_s13 = scalar_lea.sflag [#allocation3], %s716_s29 }
 0x130   : > { %p1014_p9 = pnand %p1020_p7, %p1278_p8 }
 0x132   : > { %1165 = dma.done.wait (!%p1014_p9), %s717_s13, 512  }
 0x133   : > { %1167 = vsyncadd (!%p1014_p9), %s717_s13, 4294966784  ;;  %s726_s28 = scalar_lea.sflag [#allocation5], %s716_s29 }
 0x134   : > { %1169 = dma.done.wait (!%p1014_p9), %s726_s28, 512  }
 0x135   : > { %1171 = vsyncadd (!%p1014_p9), %s726_s28, 4294966784  ;;  %s22_s23 = sadd.s32 1, %s1194_s23   ;;  %s1485_s18 = smov %s1178_s19 }
 0x136   : > { %p19_p10 = scmp.ge.s32.totalorder %s22_s23, 4   ;;  %s1486_s19 = smov %s1182_s20 }
 0x137   : > { %s1487_s20 = smov %s1284_s6  ;;  %s1488_s21 = smov %s1190_s22 }
 0x138   : > { %s1489_s22 = smov %s1491_s26  ;;  %21 = sbr.rel (!%p19_p10) target bundleno = 6 (0x6), region = 96 }
 0x13f   :  { %743 = vsyncpa [#allocation3], 1 }
 0x140   :  { %745 = vsyncpa [#allocation3 + $0x1], 1 }
 0x141   :  { %746 = vsyncpa [#allocation5], 1 }
 0x142   :  { %748 = vsyncpa [#allocation5 + $0x1], 1 }

</bundles_post_ra>
